<compile_context>
chip_gen: v7x
topology: tpu7x:2x2x1
jax: 0.10.0
libtpu: 0.0.40
codegen_flags: <defaults>
</compile_context>

<pallas_src>
import jax
import jax.numpy as jnp
import numpy as np
from jax.experimental import pallas as pl
from jax.experimental.pallas import tpu as pltpu

VOCAB = 64
EMBED = 32
HIDDEN = 32
NUM_LAYERS = 2            # kernel hard-codes the 2-layer LSTM (module default num_layers=2)
B = 2
T = 8
SUBLANES = 8
VOCAB_PAD = ((VOCAB + 127) // 128) * 128   # lane-dense logits width (= 128)


def music_lstm_kernel(gx_ref,        # (T, Bp, 4H)  layer-1 gate pre-acts (x@Wih1+b1, gate-scaled)
                      wcomb_ref,     # (2H, 8H)     [[Whh1, Wih2], [0, Whh2]] (gate-scaled)
                      slab_ref,      # (H+2, 128)   rows 0:H = Wfc, row H = b2, row H+1 = bfc
                      out_ref,       # (Bp, VOCAB_PAD) padded logits
                      state_ref):    # (Bp, 4H)     packed [h1 | c1 | h2 | c2]
    H = HIDDEN
    Tlen = gx_ref.shape[0]
    Bp = gx_ref.shape[1]

    # Weights/biases loaded exactly once, hoisted out of the recurrence.
    wcomb = wcomb_ref[...]                      # (2H, 8H)
    slab = slab_ref[...]
    wfc = slab[0:H, :]                          # (H, VOCAB_PAD)
    b2 = slab[H:H + 1, 0:4 * H]                 # (1, 4H)
    bfc = slab[H + 1:H + 2, :]                  # (1, VOCAB_PAD)

    # Per-column affine so ONE tanh pass over the whole (Bp, 4H) gate block gives
    # sigmoid for the [i, f, o] columns and tanh for the [g] columns.  The matching
    # 0.5 pre-scale of the i/f/o pre-activations is folded into the host-side weights:
    #   sigmoid(x) = 0.5 * tanh(0.5 * x) + 0.5
    col = jax.lax.broadcasted_iota(jnp.int32, (1, 4 * H), 1)
    post_a = jnp.where(col >= 3 * H, 1.0, 0.5).astype(jnp.float32)
    post_b = jnp.where(col >= 3 * H, 0.0, 0.5).astype(jnp.float32)

    def cell(gates, c):
        """gates: (Bp, 4H) pre-activations, columns [0.5*i, 0.5*f, 0.5*o, g]."""
        act = jnp.tanh(gates) * post_a + post_b        # single EUP pass for all gates
        i = act[:, 0 * H:1 * H]
        f = act[:, 1 * H:2 * H]
        o = act[:, 2 * H:3 * H]
        g = act[:, 3 * H:4 * H]
        c_new = f * c + i * g
        h_new = o * jnp.tanh(c_new)
        return h_new, c_new

    zeros = jnp.zeros((Bp, H), jnp.float32)

    # Wavefront step 0: both recurrent inputs are zero -> no matmul needed.
    h1, c1 = cell(gx_ref[0], zeros)                    # layer-1 step 0
    h2, c2 = zeros, zeros                              # layer-2 "step -1"

    # Wavefront steps s = 1..T: ONE (Bp, 2H) @ (2H, 8H) matmul feeds layer-1 step s
    # (cols 0:4H) and layer-2 step s-1 (cols 4H:8H).  Fully unrolled (T = 8).
    # TODO(synk): drive the MXU weight-stationary (pltpu.matmul_push_rhs of wcomb once,
    # matmul_acc_lhs / matmul_pop per step) to shave the per-step weight-push latency.
    for s in range(1, Tlen + 1):
        rec = jnp.dot(jnp.concatenate([h1, h2], axis=-1), wcomb,
                      preferred_element_type=jnp.float32)          # (Bp, 8H)
        if s < Tlen:
            nh1, nc1 = cell(gx_ref[s] + rec[:, 0:4 * H], c1)       # layer-1 step s
        else:
            nh1, nc1 = h1, c1
        h2, c2 = cell(rec[:, 4 * H:8 * H] + b2, c2)                # layer-2 step s-1
        h1, c1 = nh1, nc1

    # Epilogue: lane-dense (Bp, 128) stores -> unmasked vst.
    out_ref[...] = jnp.dot(h2, wfc, preferred_element_type=jnp.float32) + bfc
    state_ref[...] = jnp.concatenate([h1, c1, h2, c2], axis=-1)    # (Bp, 4H) = (Bp, 128)


def _prep_gates(w):
    """Permute gate columns (i, f, g, o) [PyTorch order] -> (i, f, o, g) and pre-scale
    the i/f/o columns by 0.5 so in-kernel sigmoid is a single tanh + affine."""
    H = HIDDEN
    return jnp.concatenate(
        [0.5 * w[..., 0:H], 0.5 * w[..., H:2 * H], 0.5 * w[..., 3 * H:4 * H],
         w[..., 2 * H:3 * H]],
        axis=-1)


def music_lstm_forward(tokens, params):
    Bsz, Tlen = tokens.shape
    H = HIDDEN
    Bp = ((Bsz + SUBLANES - 1) // SUBLANES) * SUBLANES

    wih1 = _prep_gates(params["wih1"])
    whh1 = _prep_gates(params["whh1"])
    b1 = _prep_gates(params["b1"])
    wih2 = _prep_gates(params["wih2"])
    whh2 = _prep_gates(params["whh2"])
    b2 = _prep_gates(params["b2"])

    # Fold the embedding into layer-1's input projection: one (VOCAB, 4H) table, then
    # a plain-JAX gather (embedding lookup stays glue outside the kernel).
    table = params["embed"].astype(jnp.float32) @ wih1 + b1           # (VOCAB, 4H)
    gx = jnp.take(table, tokens, axis=0)                              # (B, T, 4H)
    gx = jnp.transpose(gx, (1, 0, 2))                                 # (T, B, 4H) time-major
    gx = jnp.pad(gx, ((0, 0), (0, Bp - Bsz), (0, 0)))                 # (T, Bp, 4H) 8-sublane tiles

    # Combined recurrent weight for the wavefront loop.
    w_comb = jnp.zeros((2 * H, 8 * H), jnp.float32)
    w_comb = w_comb.at[0:H, 0:4 * H].set(whh1)
    w_comb = w_comb.at[0:H, 4 * H:8 * H].set(wih2)
    w_comb = w_comb.at[H:2 * H, 4 * H:8 * H].set(whh2)

    # fc/bias slab: rows 0:H = Wfc (zero-padded to 128 lanes), row H = b2, row H+1 = bfc.
    slab = jnp.zeros((H + 2, VOCAB_PAD), jnp.float32)
    slab = slab.at[0:H, 0:VOCAB].set(params["wfc"])
    slab = slab.at[H, 0:4 * H].set(b2[0])
    slab = slab.at[H + 1, 0:VOCAB].set(params["bfc"][0])

    vmem = lambda: pl.BlockSpec(memory_space=pltpu.MemorySpace.VMEM)  # full array resident in VMEM
    out_pad, state = pl.pallas_call(
        music_lstm_kernel,
        out_shape=(
            jax.ShapeDtypeStruct((Bp, VOCAB_PAD), jnp.float32),
            jax.ShapeDtypeStruct((Bp, 4 * H), jnp.float32),
        ),
        in_specs=[vmem(), vmem(), vmem()],
        out_specs=(vmem(), vmem()),
    )(gx, w_comb, slab)

    logits = out_pad[:Bsz, :VOCAB]
    hn = jnp.stack([state[:Bsz, 0 * H:1 * H], state[:Bsz, 2 * H:3 * H]])   # (2, B, H)
    cn = jnp.stack([state[:Bsz, 1 * H:2 * H], state[:Bsz, 3 * H:4 * H]])   # (2, B, H)
    # TODO(synk): for real batch sizes, add a leading "parallel" batch grid axis (or
    # pl.core_map over the 2-core mesh on v7x) and process many sequences per call;
    # a single B=2 recurrence is inherently serial and leaves the second TC idle.
    return logits, (hn, cn)


def reference_forward(tokens, params):
    """Pure-JAX reference matching torch semantics (zero initial hidden)."""
    emb = jnp.take(params["embed"], tokens, axis=0).astype(jnp.float32)  # (B,T,E)

    def layer(x_seq, wih, whh, b):
        H = whh.shape[0]

        def step(carry, xt):
            h, c = carry
            gates = xt @ wih + h @ whh + b
            i = jax.nn.sigmoid(gates[:, 0 * H:1 * H])
            f = jax.nn.sigmoid(gates[:, 1 * H:2 * H])
            g = jnp.tanh(gates[:, 2 * H:3 * H])
            o = jax.nn.sigmoid(gates[:, 3 * H:4 * H])
            c = f * c + i * g
            h = o * jnp.tanh(c)
            return (h, c), h

        Bsz = x_seq.shape[0]
        init = (jnp.zeros((Bsz, H), jnp.float32), jnp.zeros((Bsz, H), jnp.float32))
        (h, c), hs = jax.lax.scan(step, init, jnp.transpose(x_seq, (1, 0, 2)))
        return jnp.transpose(hs, (1, 0, 2)), h, c

    seq1, h1, c1 = layer(emb, params["wih1"], params["whh1"], params["b1"])
    seq2, h2, c2 = layer(seq1, params["wih2"], params["whh2"], params["b2"])
    logits = seq2[:, -1, :] @ params["wfc"] + params["bfc"][0]
    return logits, (jnp.stack([h1, h2]), jnp.stack([c1, c2]))


def init_params(key):
    ks = jax.random.split(key, 9)
    k = 1.0 / np.sqrt(HIDDEN)
    u = lambda kk, shape: jax.random.uniform(kk, shape, jnp.float32, -k, k)
    return {
        "embed": jax.random.normal(ks[0], (VOCAB, EMBED), jnp.float32),
        # layer 1 (input dim = EMBED); b = b_ih + b_hh folded; PyTorch gate order
        # (i, f, g, o), weights stored transposed as (in_dim, 4H).
        "wih1": u(ks[1], (EMBED, 4 * HIDDEN)),
        "whh1": u(ks[2], (HIDDEN, 4 * HIDDEN)),
        "b1": u(ks[3], (1, 4 * HIDDEN)),
        # layer 2 (input dim = HIDDEN)
        "wih2": u(ks[4], (HIDDEN, 4 * HIDDEN)),
        "whh2": u(ks[5], (HIDDEN, 4 * HIDDEN)),
        "b2": u(ks[6], (1, 4 * HIDDEN)),
        # fc
        "wfc": u(ks[7], (HIDDEN, VOCAB)),
        "bfc": u(ks[8], (1, VOCAB)),
    }


if __name__ == "__main__":
    key = jax.random.PRNGKey(0)
    pkey, tkey = jax.random.split(key)
    params = init_params(pkey)
    tokens = jax.random.randint(tkey, (B, T), 0, VOCAB, dtype=jnp.int32)

    fwd = jax.jit(music_lstm_forward)
    out, (hn, cn) = fwd(tokens, params)
    out = jax.block_until_ready(out)
    hn = jax.block_until_ready(hn)
    cn = jax.block_until_ready(cn)

    ref_out, (ref_hn, ref_cn) = reference_forward(tokens, params)
    np.testing.assert_allclose(np.asarray(out), np.asarray(ref_out), rtol=1e-4, atol=1e-4)
    np.testing.assert_allclose(np.asarray(hn), np.asarray(ref_hn), rtol=1e-4, atol=1e-4)
    np.testing.assert_allclose(np.asarray(cn), np.asarray(ref_cn), rtol=1e-4, atol=1e-4)

    print("KERNEL_OK")
</pallas_src>

<mosaic_0001>
module attributes {stable_mosaic.version = 11 : i64} {
  func.func @music_lstm_kernel(%arg0: memref<8x8x128xf32, #tpu.memory_space<vmem>>, %arg1: memref<64x256xf32, #tpu.memory_space<vmem>>, %arg2: memref<34x128xf32, #tpu.memory_space<vmem>>, %arg3: memref<8x128xf32, #tpu.memory_space<vmem>>, %arg4: memref<8x128xf32, #tpu.memory_space<vmem>>) attributes {dimension_semantics = [], scalar_prefetch = 0 : i64, scratch_operands = 0 : i64, tpu.core_type = #tpu.core_type<tc>} {
    %c0 = arith.constant 0 : index
    %c0_0 = arith.constant 0 : index
    %0 = vector.load %arg1[%c0, %c0_0] : memref<64x256xf32, #tpu.memory_space<vmem>>, vector<64x256xf32>
    %c0_1 = arith.constant 0 : index
    %c0_2 = arith.constant 0 : index
    %1 = vector.load %arg2[%c0_1, %c0_2] : memref<34x128xf32, #tpu.memory_space<vmem>>, vector<34x128xf32>
    %2 = vector.extract_strided_slice %1 {offsets = [0, 0], sizes = [32, 128], strides = [1, 1]} : vector<34x128xf32> to vector<32x128xf32>
    %3 = vector.extract_strided_slice %1 {offsets = [32, 0], sizes = [1, 128], strides = [1, 1]} : vector<34x128xf32> to vector<1x128xf32>
    %4 = vector.extract_strided_slice %1 {offsets = [33, 0], sizes = [1, 128], strides = [1, 1]} : vector<34x128xf32> to vector<1x128xf32>
    %5 = tpu.iota {dimensions = array<i32: 1>} : vector<1x128xi32>
    %c96_i32 = arith.constant 96 : i32
    %6 = vector.broadcast %c96_i32 : i32 to vector<1x128xi32>
    %7 = arith.cmpi sge, %5, %6 : vector<1x128xi32>
    %cst = arith.constant 1.000000e+00 : f32
    %cst_3 = arith.constant 5.000000e-01 : f32
    %8 = vector.broadcast %cst : f32 to vector<1x128xf32>
    %9 = vector.broadcast %cst_3 : f32 to vector<1x128xf32>
    %10 = arith.select %7, %8, %9 : vector<1x128xi1>, vector<1x128xf32>
    %c96_i32_4 = arith.constant 96 : i32
    %11 = vector.broadcast %c96_i32_4 : i32 to vector<1x128xi32>
    %12 = arith.cmpi sge, %5, %11 : vector<1x128xi32>
    %cst_5 = arith.constant 0.000000e+00 : f32
    %cst_6 = arith.constant 5.000000e-01 : f32
    %13 = vector.broadcast %cst_5 : f32 to vector<1x128xf32>
    %14 = vector.broadcast %cst_6 : f32 to vector<1x128xf32>
    %15 = arith.select %12, %13, %14 : vector<1x128xi1>, vector<1x128xf32>
    %cst_7 = arith.constant 0.000000e+00 : f32
    %16 = vector.broadcast %cst_7 : f32 to vector<8x32xf32>
    %c0_8 = arith.constant 0 : index
    %c0_9 = arith.constant 0 : index
    %c0_10 = arith.constant 0 : index
    %17 = vector.load %arg0[%c0_8, %c0_9, %c0_10] : memref<8x8x128xf32, #tpu.memory_space<vmem>>, vector<1x8x128xf32>
    %18 = vector.shape_cast %17 : vector<1x8x128xf32> to vector<8x128xf32>
    %19 = math.tanh %18 : vector<8x128xf32>
    %20 = vector.broadcast %10 : vector<1x128xf32> to vector<8x128xf32>
    %21 = arith.mulf %19, %20 : vector<8x128xf32>
    %22 = vector.broadcast %15 : vector<1x128xf32> to vector<8x128xf32>
    %23 = arith.addf %21, %22 : vector<8x128xf32>
    %24 = vector.extract_strided_slice %23 {offsets = [0, 0], sizes = [8, 32], strides = [1, 1]} : vector<8x128xf32> to vector<8x32xf32>
    %25 = vector.extract_strided_slice %23 {offsets = [0, 32], sizes = [8, 32], strides = [1, 1]} : vector<8x128xf32> to vector<8x32xf32>
    %26 = vector.extract_strided_slice %23 {offsets = [0, 64], sizes = [8, 32], strides = [1, 1]} : vector<8x128xf32> to vector<8x32xf32>
    %27 = vector.extract_strided_slice %23 {offsets = [0, 96], sizes = [8, 32], strides = [1, 1]} : vector<8x128xf32> to vector<8x32xf32>
    %28 = arith.mulf %25, %16 : vector<8x32xf32>
    %29 = arith.mulf %24, %27 : vector<8x32xf32>
    %30 = arith.addf %28, %29 : vector<8x32xf32>
    %31 = math.tanh %30 : vector<8x32xf32>
    %32 = arith.mulf %26, %31 : vector<8x32xf32>
    %33 = tpu.concatenate %32, %16 in 1 : vector<8x32xf32>, vector<8x32xf32> -> vector<8x64xf32>
    %cst_11 = arith.constant dense<0.000000e+00> : vector<8x256xf32>
    %34 = tpu.matmul %33, %0, %cst_11 {dimension_numbers = #tpu.dot_dimension_numbers<[1], [0], [0], [1], [0, 0, 1, 1], [], []>} : vector<8x64xf32>, vector<64x256xf32>, vector<8x256xf32> -> vector<8x256xf32>
    %c1 = arith.constant 1 : index
    %c0_12 = arith.constant 0 : index
    %c0_13 = arith.constant 0 : index
    %35 = vector.load %arg0[%c1, %c0_12, %c0_13] : memref<8x8x128xf32, #tpu.memory_space<vmem>>, vector<1x8x128xf32>
    %36 = vector.shape_cast %35 : vector<1x8x128xf32> to vector<8x128xf32>
    %37 = vector.extract_strided_slice %34 {offsets = [0, 0], sizes = [8, 128], strides = [1, 1]} : vector<8x256xf32> to vector<8x128xf32>
    %38 = arith.addf %36, %37 : vector<8x128xf32>
    %39 = math.tanh %38 : vector<8x128xf32>
    %40 = vector.broadcast %10 : vector<1x128xf32> to vector<8x128xf32>
    %41 = arith.mulf %39, %40 : vector<8x128xf32>
    %42 = vector.broadcast %15 : vector<1x128xf32> to vector<8x128xf32>
    %43 = arith.addf %41, %42 : vector<8x128xf32>
    %44 = vector.extract_strided_slice %43 {offsets = [0, 0], sizes = [8, 32], strides = [1, 1]} : vector<8x128xf32> to vector<8x32xf32>
    %45 = vector.extract_strided_slice %43 {offsets = [0, 32], sizes = [8, 32], strides = [1, 1]} : vector<8x128xf32> to vector<8x32xf32>
    %46 = vector.extract_strided_slice %43 {offsets = [0, 64], sizes = [8, 32], strides = [1, 1]} : vector<8x128xf32> to vector<8x32xf32>
    %47 = vector.extract_strided_slice %43 {offsets = [0, 96], sizes = [8, 32], strides = [1, 1]} : vector<8x128xf32> to vector<8x32xf32>
    %48 = arith.mulf %45, %30 : vector<8x32xf32>
    %49 = arith.mulf %44, %47 : vector<8x32xf32>
    %50 = arith.addf %48, %49 : vector<8x32xf32>
    %51 = math.tanh %50 : vector<8x32xf32>
    %52 = arith.mulf %46, %51 : vector<8x32xf32>
    %53 = vector.extract_strided_slice %34 {offsets = [0, 128], sizes = [8, 128], strides = [1, 1]} : vector<8x256xf32> to vector<8x128xf32>
    %54 = vector.broadcast %3 : vector<1x128xf32> to vector<8x128xf32>
    %55 = arith.addf %53, %54 : vector<8x128xf32>
    %56 = math.tanh %55 : vector<8x128xf32>
    %57 = vector.broadcast %10 : vector<1x128xf32> to vector<8x128xf32>
    %58 = arith.mulf %56, %57 : vector<8x128xf32>
    %59 = vector.broadcast %15 : vector<1x128xf32> to vector<8x128xf32>
    %60 = arith.addf %58, %59 : vector<8x128xf32>
    %61 = vector.extract_strided_slice %60 {offsets = [0, 0], sizes = [8, 32], strides = [1, 1]} : vector<8x128xf32> to vector<8x32xf32>
    %62 = vector.extract_strided_slice %60 {offsets = [0, 32], sizes = [8, 32], strides = [1, 1]} : vector<8x128xf32> to vector<8x32xf32>
    %63 = vector.extract_strided_slice %60 {offsets = [0, 64], sizes = [8, 32], strides = [1, 1]} : vector<8x128xf32> to vector<8x32xf32>
    %64 = vector.extract_strided_slice %60 {offsets = [0, 96], sizes = [8, 32], strides = [1, 1]} : vector<8x128xf32> to vector<8x32xf32>
    %65 = arith.mulf %62, %16 : vector<8x32xf32>
    %66 = arith.mulf %61, %64 : vector<8x32xf32>
    %67 = arith.addf %65, %66 : vector<8x32xf32>
    %68 = math.tanh %67 : vector<8x32xf32>
    %69 = arith.mulf %63, %68 : vector<8x32xf32>
    %70 = tpu.concatenate %52, %69 in 1 : vector<8x32xf32>, vector<8x32xf32> -> vector<8x64xf32>
    %cst_14 = arith.constant dense<0.000000e+00> : vector<8x256xf32>
    %71 = tpu.matmul %70, %0, %cst_14 {dimension_numbers = #tpu.dot_dimension_numbers<[1], [0], [0], [1], [0, 0, 1, 1], [], []>} : vector<8x64xf32>, vector<64x256xf32>, vector<8x256xf32> -> vector<8x256xf32>
    %c2 = arith.constant 2 : index
    %c0_15 = arith.constant 0 : index
    %c0_16 = arith.constant 0 : index
    %72 = vector.load %arg0[%c2, %c0_15, %c0_16] : memref<8x8x128xf32, #tpu.memory_space<vmem>>, vector<1x8x128xf32>
    %73 = vector.shape_cast %72 : vector<1x8x128xf32> to vector<8x128xf32>
    %74 = vector.extract_strided_slice %71 {offsets = [0, 0], sizes = [8, 128], strides = [1, 1]} : vector<8x256xf32> to vector<8x128xf32>
    %75 = arith.addf %73, %74 : vector<8x128xf32>
    %76 = math.tanh %75 : vector<8x128xf32>
    %77 = vector.broadcast %10 : vector<1x128xf32> to vector<8x128xf32>
    %78 = arith.mulf %76, %77 : vector<8x128xf32>
    %79 = vector.broadcast %15 : vector<1x128xf32> to vector<8x128xf32>
    %80 = arith.addf %78, %79 : vector<8x128xf32>
    %81 = vector.extract_strided_slice %80 {offsets = [0, 0], sizes = [8, 32], strides = [1, 1]} : vector<8x128xf32> to vector<8x32xf32>
    %82 = vector.extract_strided_slice %80 {offsets = [0, 32], sizes = [8, 32], strides = [1, 1]} : vector<8x128xf32> to vector<8x32xf32>
    %83 = vector.extract_strided_slice %80 {offsets = [0, 64], sizes = [8, 32], strides = [1, 1]} : vector<8x128xf32> to vector<8x32xf32>
    %84 = vector.extract_strided_slice %80 {offsets = [0, 96], sizes = [8, 32], strides = [1, 1]} : vector<8x128xf32> to vector<8x32xf32>
    %85 = arith.mulf %82, %50 : vector<8x32xf32>
    %86 = arith.mulf %81, %84 : vector<8x32xf32>
    %87 = arith.addf %85, %86 : vector<8x32xf32>
    %88 = math.tanh %87 : vector<8x32xf32>
    %89 = arith.mulf %83, %88 : vector<8x32xf32>
    %90 = vector.extract_strided_slice %71 {offsets = [0, 128], sizes = [8, 128], strides = [1, 1]} : vector<8x256xf32> to vector<8x128xf32>
    %91 = vector.broadcast %3 : vector<1x128xf32> to vector<8x128xf32>
    %92 = arith.addf %90, %91 : vector<8x128xf32>
    %93 = math.tanh %92 : vector<8x128xf32>
    %94 = vector.broadcast %10 : vector<1x128xf32> to vector<8x128xf32>
    %95 = arith.mulf %93, %94 : vector<8x128xf32>
    %96 = vector.broadcast %15 : vector<1x128xf32> to vector<8x128xf32>
    %97 = arith.addf %95, %96 : vector<8x128xf32>
    %98 = vector.extract_strided_slice %97 {offsets = [0, 0], sizes = [8, 32], strides = [1, 1]} : vector<8x128xf32> to vector<8x32xf32>
    %99 = vector.extract_strided_slice %97 {offsets = [0, 32], sizes = [8, 32], strides = [1, 1]} : vector<8x128xf32> to vector<8x32xf32>
    %100 = vector.extract_strided_slice %97 {offsets = [0, 64], sizes = [8, 32], strides = [1, 1]} : vector<8x128xf32> to vector<8x32xf32>
    %101 = vector.extract_strided_slice %97 {offsets = [0, 96], sizes = [8, 32], strides = [1, 1]} : vector<8x128xf32> to vector<8x32xf32>
    %102 = arith.mulf %99, %67 : vector<8x32xf32>
    %103 = arith.mulf %98, %101 : vector<8x32xf32>
    %104 = arith.addf %102, %103 : vector<8x32xf32>
    %105 = math.tanh %104 : vector<8x32xf32>
    %106 = arith.mulf %100, %105 : vector<8x32xf32>
    %107 = tpu.concatenate %89, %106 in 1 : vector<8x32xf32>, vector<8x32xf32> -> vector<8x64xf32>
    %cst_17 = arith.constant dense<0.000000e+00> : vector<8x256xf32>
    %108 = tpu.matmul %107, %0, %cst_17 {dimension_numbers = #tpu.dot_dimension_numbers<[1], [0], [0], [1], [0, 0, 1, 1], [], []>} : vector<8x64xf32>, vector<64x256xf32>, vector<8x256xf32> -> vector<8x256xf32>
    %c3 = arith.constant 3 : index
    %c0_18 = arith.constant 0 : index
    %c0_19 = arith.constant 0 : index
    %109 = vector.load %arg0[%c3, %c0_18, %c0_19] : memref<8x8x128xf32, #tpu.memory_space<vmem>>, vector<1x8x128xf32>
    %110 = vector.shape_cast %109 : vector<1x8x128xf32> to vector<8x128xf32>
    %111 = vector.extract_strided_slice %108 {offsets = [0, 0], sizes = [8, 128], strides = [1, 1]} : vector<8x256xf32> to vector<8x128xf32>
    %112 = arith.addf %110, %111 : vector<8x128xf32>
    %113 = math.tanh %112 : vector<8x128xf32>
    %114 = vector.broadcast %10 : vector<1x128xf32> to vector<8x128xf32>
    %115 = arith.mulf %113, %114 : vector<8x128xf32>
    %116 = vector.broadcast %15 : vector<1x128xf32> to vector<8x128xf32>
    %117 = arith.addf %115, %116 : vector<8x128xf32>
    %118 = vector.extract_strided_slice %117 {offsets = [0, 0], sizes = [8, 32], strides = [1, 1]} : vector<8x128xf32> to vector<8x32xf32>
    %119 = vector.extract_strided_slice %117 {offsets = [0, 32], sizes = [8, 32], strides = [1, 1]} : vector<8x128xf32> to vector<8x32xf32>
    %120 = vector.extract_strided_slice %117 {offsets = [0, 64], sizes = [8, 32], strides = [1, 1]} : vector<8x128xf32> to vector<8x32xf32>
    %121 = vector.extract_strided_slice %117 {offsets = [0, 96], sizes = [8, 32], strides = [1, 1]} : vector<8x128xf32> to vector<8x32xf32>
    %122 = arith.mulf %119, %87 : vector<8x32xf32>
    %123 = arith.mulf %118, %121 : vector<8x32xf32>
    %124 = arith.addf %122, %123 : vector<8x32xf32>
    %125 = math.tanh %124 : vector<8x32xf32>
    %126 = arith.mulf %120, %125 : vector<8x32xf32>
    %127 = vector.extract_strided_slice %108 {offsets = [0, 128], sizes = [8, 128], strides = [1, 1]} : vector<8x256xf32> to vector<8x128xf32>
    %128 = vector.broadcast %3 : vector<1x128xf32> to vector<8x128xf32>
    %129 = arith.addf %127, %128 : vector<8x128xf32>
    %130 = math.tanh %129 : vector<8x128xf32>
    %131 = vector.broadcast %10 : vector<1x128xf32> to vector<8x128xf32>
    %132 = arith.mulf %130, %131 : vector<8x128xf32>
    %133 = vector.broadcast %15 : vector<1x128xf32> to vector<8x128xf32>
    %134 = arith.addf %132, %133 : vector<8x128xf32>
    %135 = vector.extract_strided_slice %134 {offsets = [0, 0], sizes = [8, 32], strides = [1, 1]} : vector<8x128xf32> to vector<8x32xf32>
    %136 = vector.extract_strided_slice %134 {offsets = [0, 32], sizes = [8, 32], strides = [1, 1]} : vector<8x128xf32> to vector<8x32xf32>
    %137 = vector.extract_strided_slice %134 {offsets = [0, 64], sizes = [8, 32], strides = [1, 1]} : vector<8x128xf32> to vector<8x32xf32>
    %138 = vector.extract_strided_slice %134 {offsets = [0, 96], sizes = [8, 32], strides = [1, 1]} : vector<8x128xf32> to vector<8x32xf32>
    %139 = arith.mulf %136, %104 : vector<8x32xf32>
    %140 = arith.mulf %135, %138 : vector<8x32xf32>
    %141 = arith.addf %139, %140 : vector<8x32xf32>
    %142 = math.tanh %141 : vector<8x32xf32>
    %143 = arith.mulf %137, %142 : vector<8x32xf32>
    %144 = tpu.concatenate %126, %143 in 1 : vector<8x32xf32>, vector<8x32xf32> -> vector<8x64xf32>
    %cst_20 = arith.constant dense<0.000000e+00> : vector<8x256xf32>
    %145 = tpu.matmul %144, %0, %cst_20 {dimension_numbers = #tpu.dot_dimension_numbers<[1], [0], [0], [1], [0, 0, 1, 1], [], []>} : vector<8x64xf32>, vector<64x256xf32>, vector<8x256xf32> -> vector<8x256xf32>
    %c4 = arith.constant 4 : index
    %c0_21 = arith.constant 0 : index
    %c0_22 = arith.constant 0 : index
    %146 = vector.load %arg0[%c4, %c0_21, %c0_22] : memref<8x8x128xf32, #tpu.memory_space<vmem>>, vector<1x8x128xf32>
    %147 = vector.shape_cast %146 : vector<1x8x128xf32> to vector<8x128xf32>
    %148 = vector.extract_strided_slice %145 {offsets = [0, 0], sizes = [8, 128], strides = [1, 1]} : vector<8x256xf32> to vector<8x128xf32>
    %149 = arith.addf %147, %148 : vector<8x128xf32>
    %150 = math.tanh %149 : vector<8x128xf32>
    %151 = vector.broadcast %10 : vector<1x128xf32> to vector<8x128xf32>
    %152 = arith.mulf %150, %151 : vector<8x128xf32>
    %153 = vector.broadcast %15 : vector<1x128xf32> to vector<8x128xf32>
    %154 = arith.addf %152, %153 : vector<8x128xf32>
    %155 = vector.extract_strided_slice %154 {offsets = [0, 0], sizes = [8, 32], strides = [1, 1]} : vector<8x128xf32> to vector<8x32xf32>
    %156 = vector.extract_strided_slice %154 {offsets = [0, 32], sizes = [8, 32], strides = [1, 1]} : vector<8x128xf32> to vector<8x32xf32>
    %157 = vector.extract_strided_slice %154 {offsets = [0, 64], sizes = [8, 32], strides = [1, 1]} : vector<8x128xf32> to vector<8x32xf32>
    %158 = vector.extract_strided_slice %154 {offsets = [0, 96], sizes = [8, 32], strides = [1, 1]} : vector<8x128xf32> to vector<8x32xf32>
    %159 = arith.mulf %156, %124 : vector<8x32xf32>
    %160 = arith.mulf %155, %158 : vector<8x32xf32>
    %161 = arith.addf %159, %160 : vector<8x32xf32>
    %162 = math.tanh %161 : vector<8x32xf32>
    %163 = arith.mulf %157, %162 : vector<8x32xf32>
    %164 = vector.extract_strided_slice %145 {offsets = [0, 128], sizes = [8, 128], strides = [1, 1]} : vector<8x256xf32> to vector<8x128xf32>
    %165 = vector.broadcast %3 : vector<1x128xf32> to vector<8x128xf32>
    %166 = arith.addf %164, %165 : vector<8x128xf32>
    %167 = math.tanh %166 : vector<8x128xf32>
    %168 = vector.broadcast %10 : vector<1x128xf32> to vector<8x128xf32>
    %169 = arith.mulf %167, %168 : vector<8x128xf32>
    %170 = vector.broadcast %15 : vector<1x128xf32> to vector<8x128xf32>
    %171 = arith.addf %169, %170 : vector<8x128xf32>
    %172 = vector.extract_strided_slice %171 {offsets = [0, 0], sizes = [8, 32], strides = [1, 1]} : vector<8x128xf32> to vector<8x32xf32>
    %173 = vector.extract_strided_slice %171 {offsets = [0, 32], sizes = [8, 32], strides = [1, 1]} : vector<8x128xf32> to vector<8x32xf32>
    %174 = vector.extract_strided_slice %171 {offsets = [0, 64], sizes = [8, 32], strides = [1, 1]} : vector<8x128xf32> to vector<8x32xf32>
    %175 = vector.extract_strided_slice %171 {offsets = [0, 96], sizes = [8, 32], strides = [1, 1]} : vector<8x128xf32> to vector<8x32xf32>
    %176 = arith.mulf %173, %141 : vector<8x32xf32>
    %177 = arith.mulf %172, %175 : vector<8x32xf32>
    %178 = arith.addf %176, %177 : vector<8x32xf32>
    %179 = math.tanh %178 : vector<8x32xf32>
    %180 = arith.mulf %174, %179 : vector<8x32xf32>
    %181 = tpu.concatenate %163, %180 in 1 : vector<8x32xf32>, vector<8x32xf32> -> vector<8x64xf32>
    %cst_23 = arith.constant dense<0.000000e+00> : vector<8x256xf32>
    %182 = tpu.matmul %181, %0, %cst_23 {dimension_numbers = #tpu.dot_dimension_numbers<[1], [0], [0], [1], [0, 0, 1, 1], [], []>} : vector<8x64xf32>, vector<64x256xf32>, vector<8x256xf32> -> vector<8x256xf32>
    %c5 = arith.constant 5 : index
    %c0_24 = arith.constant 0 : index
    %c0_25 = arith.constant 0 : index
    %183 = vector.load %arg0[%c5, %c0_24, %c0_25] : memref<8x8x128xf32, #tpu.memory_space<vmem>>, vector<1x8x128xf32>
    %184 = vector.shape_cast %183 : vector<1x8x128xf32> to vector<8x128xf32>
    %185 = vector.extract_strided_slice %182 {offsets = [0, 0], sizes = [8, 128], strides = [1, 1]} : vector<8x256xf32> to vector<8x128xf32>
    %186 = arith.addf %184, %185 : vector<8x128xf32>
    %187 = math.tanh %186 : vector<8x128xf32>
    %188 = vector.broadcast %10 : vector<1x128xf32> to vector<8x128xf32>
    %189 = arith.mulf %187, %188 : vector<8x128xf32>
    %190 = vector.broadcast %15 : vector<1x128xf32> to vector<8x128xf32>
    %191 = arith.addf %189, %190 : vector<8x128xf32>
    %192 = vector.extract_strided_slice %191 {offsets = [0, 0], sizes = [8, 32], strides = [1, 1]} : vector<8x128xf32> to vector<8x32xf32>
    %193 = vector.extract_strided_slice %191 {offsets = [0, 32], sizes = [8, 32], strides = [1, 1]} : vector<8x128xf32> to vector<8x32xf32>
    %194 = vector.extract_strided_slice %191 {offsets = [0, 64], sizes = [8, 32], strides = [1, 1]} : vector<8x128xf32> to vector<8x32xf32>
    %195 = vector.extract_strided_slice %191 {offsets = [0, 96], sizes = [8, 32], strides = [1, 1]} : vector<8x128xf32> to vector<8x32xf32>
    %196 = arith.mulf %193, %161 : vector<8x32xf32>
    %197 = arith.mulf %192, %195 : vector<8x32xf32>
    %198 = arith.addf %196, %197 : vector<8x32xf32>
    %199 = math.tanh %198 : vector<8x32xf32>
    %200 = arith.mulf %194, %199 : vector<8x32xf32>
    %201 = vector.extract_strided_slice %182 {offsets = [0, 128], sizes = [8, 128], strides = [1, 1]} : vector<8x256xf32> to vector<8x128xf32>
    %202 = vector.broadcast %3 : vector<1x128xf32> to vector<8x128xf32>
    %203 = arith.addf %201, %202 : vector<8x128xf32>
    %204 = math.tanh %203 : vector<8x128xf32>
    %205 = vector.broadcast %10 : vector<1x128xf32> to vector<8x128xf32>
    %206 = arith.mulf %204, %205 : vector<8x128xf32>
    %207 = vector.broadcast %15 : vector<1x128xf32> to vector<8x128xf32>
    %208 = arith.addf %206, %207 : vector<8x128xf32>
    %209 = vector.extract_strided_slice %208 {offsets = [0, 0], sizes = [8, 32], strides = [1, 1]} : vector<8x128xf32> to vector<8x32xf32>
    %210 = vector.extract_strided_slice %208 {offsets = [0, 32], sizes = [8, 32], strides = [1, 1]} : vector<8x128xf32> to vector<8x32xf32>
    %211 = vector.extract_strided_slice %208 {offsets = [0, 64], sizes = [8, 32], strides = [1, 1]} : vector<8x128xf32> to vector<8x32xf32>
    %212 = vector.extract_strided_slice %208 {offsets = [0, 96], sizes = [8, 32], strides = [1, 1]} : vector<8x128xf32> to vector<8x32xf32>
    %213 = arith.mulf %210, %178 : vector<8x32xf32>
    %214 = arith.mulf %209, %212 : vector<8x32xf32>
    %215 = arith.addf %213, %214 : vector<8x32xf32>
    %216 = math.tanh %215 : vector<8x32xf32>
    %217 = arith.mulf %211, %216 : vector<8x32xf32>
    %218 = tpu.concatenate %200, %217 in 1 : vector<8x32xf32>, vector<8x32xf32> -> vector<8x64xf32>
    %cst_26 = arith.constant dense<0.000000e+00> : vector<8x256xf32>
    %219 = tpu.matmul %218, %0, %cst_26 {dimension_numbers = #tpu.dot_dimension_numbers<[1], [0], [0], [1], [0, 0, 1, 1], [], []>} : vector<8x64xf32>, vector<64x256xf32>, vector<8x256xf32> -> vector<8x256xf32>
    %c6 = arith.constant 6 : index
    %c0_27 = arith.constant 0 : index
    %c0_28 = arith.constant 0 : index
    %220 = vector.load %arg0[%c6, %c0_27, %c0_28] : memref<8x8x128xf32, #tpu.memory_space<vmem>>, vector<1x8x128xf32>
    %221 = vector.shape_cast %220 : vector<1x8x128xf32> to vector<8x128xf32>
    %222 = vector.extract_strided_slice %219 {offsets = [0, 0], sizes = [8, 128], strides = [1, 1]} : vector<8x256xf32> to vector<8x128xf32>
    %223 = arith.addf %221, %222 : vector<8x128xf32>
    %224 = math.tanh %223 : vector<8x128xf32>
    %225 = vector.broadcast %10 : vector<1x128xf32> to vector<8x128xf32>
    %226 = arith.mulf %224, %225 : vector<8x128xf32>
    %227 = vector.broadcast %15 : vector<1x128xf32> to vector<8x128xf32>
    %228 = arith.addf %226, %227 : vector<8x128xf32>
    %229 = vector.extract_strided_slice %228 {offsets = [0, 0], sizes = [8, 32], strides = [1, 1]} : vector<8x128xf32> to vector<8x32xf32>
    %230 = vector.extract_strided_slice %228 {offsets = [0, 32], sizes = [8, 32], strides = [1, 1]} : vector<8x128xf32> to vector<8x32xf32>
    %231 = vector.extract_strided_slice %228 {offsets = [0, 64], sizes = [8, 32], strides = [1, 1]} : vector<8x128xf32> to vector<8x32xf32>
    %232 = vector.extract_strided_slice %228 {offsets = [0, 96], sizes = [8, 32], strides = [1, 1]} : vector<8x128xf32> to vector<8x32xf32>
    %233 = arith.mulf %230, %198 : vector<8x32xf32>
    %234 = arith.mulf %229, %232 : vector<8x32xf32>
    %235 = arith.addf %233, %234 : vector<8x32xf32>
    %236 = math.tanh %235 : vector<8x32xf32>
    %237 = arith.mulf %231, %236 : vector<8x32xf32>
    %238 = vector.extract_strided_slice %219 {offsets = [0, 128], sizes = [8, 128], strides = [1, 1]} : vector<8x256xf32> to vector<8x128xf32>
    %239 = vector.broadcast %3 : vector<1x128xf32> to vector<8x128xf32>
    %240 = arith.addf %238, %239 : vector<8x128xf32>
    %241 = math.tanh %240 : vector<8x128xf32>
    %242 = vector.broadcast %10 : vector<1x128xf32> to vector<8x128xf32>
    %243 = arith.mulf %241, %242 : vector<8x128xf32>
    %244 = vector.broadcast %15 : vector<1x128xf32> to vector<8x128xf32>
    %245 = arith.addf %243, %244 : vector<8x128xf32>
    %246 = vector.extract_strided_slice %245 {offsets = [0, 0], sizes = [8, 32], strides = [1, 1]} : vector<8x128xf32> to vector<8x32xf32>
    %247 = vector.extract_strided_slice %245 {offsets = [0, 32], sizes = [8, 32], strides = [1, 1]} : vector<8x128xf32> to vector<8x32xf32>
    %248 = vector.extract_strided_slice %245 {offsets = [0, 64], sizes = [8, 32], strides = [1, 1]} : vector<8x128xf32> to vector<8x32xf32>
    %249 = vector.extract_strided_slice %245 {offsets = [0, 96], sizes = [8, 32], strides = [1, 1]} : vector<8x128xf32> to vector<8x32xf32>
    %250 = arith.mulf %247, %215 : vector<8x32xf32>
    %251 = arith.mulf %246, %249 : vector<8x32xf32>
    %252 = arith.addf %250, %251 : vector<8x32xf32>
    %253 = math.tanh %252 : vector<8x32xf32>
    %254 = arith.mulf %248, %253 : vector<8x32xf32>
    %255 = tpu.concatenate %237, %254 in 1 : vector<8x32xf32>, vector<8x32xf32> -> vector<8x64xf32>
    %cst_29 = arith.constant dense<0.000000e+00> : vector<8x256xf32>
    %256 = tpu.matmul %255, %0, %cst_29 {dimension_numbers = #tpu.dot_dimension_numbers<[1], [0], [0], [1], [0, 0, 1, 1], [], []>} : vector<8x64xf32>, vector<64x256xf32>, vector<8x256xf32> -> vector<8x256xf32>
    %c7 = arith.constant 7 : index
    %c0_30 = arith.constant 0 : index
    %c0_31 = arith.constant 0 : index
    %257 = vector.load %arg0[%c7, %c0_30, %c0_31] : memref<8x8x128xf32, #tpu.memory_space<vmem>>, vector<1x8x128xf32>
    %258 = vector.shape_cast %257 : vector<1x8x128xf32> to vector<8x128xf32>
    %259 = vector.extract_strided_slice %256 {offsets = [0, 0], sizes = [8, 128], strides = [1, 1]} : vector<8x256xf32> to vector<8x128xf32>
    %260 = arith.addf %258, %259 : vector<8x128xf32>
    %261 = math.tanh %260 : vector<8x128xf32>
    %262 = vector.broadcast %10 : vector<1x128xf32> to vector<8x128xf32>
    %263 = arith.mulf %261, %262 : vector<8x128xf32>
    %264 = vector.broadcast %15 : vector<1x128xf32> to vector<8x128xf32>
    %265 = arith.addf %263, %264 : vector<8x128xf32>
    %266 = vector.extract_strided_slice %265 {offsets = [0, 0], sizes = [8, 32], strides = [1, 1]} : vector<8x128xf32> to vector<8x32xf32>
    %267 = vector.extract_strided_slice %265 {offsets = [0, 32], sizes = [8, 32], strides = [1, 1]} : vector<8x128xf32> to vector<8x32xf32>
    %268 = vector.extract_strided_slice %265 {offsets = [0, 64], sizes = [8, 32], strides = [1, 1]} : vector<8x128xf32> to vector<8x32xf32>
    %269 = vector.extract_strided_slice %265 {offsets = [0, 96], sizes = [8, 32], strides = [1, 1]} : vector<8x128xf32> to vector<8x32xf32>
    %270 = arith.mulf %267, %235 : vector<8x32xf32>
    %271 = arith.mulf %266, %269 : vector<8x32xf32>
    %272 = arith.addf %270, %271 : vector<8x32xf32>
    %273 = math.tanh %272 : vector<8x32xf32>
    %274 = arith.mulf %268, %273 : vector<8x32xf32>
    %275 = vector.extract_strided_slice %256 {offsets = [0, 128], sizes = [8, 128], strides = [1, 1]} : vector<8x256xf32> to vector<8x128xf32>
    %276 = vector.broadcast %3 : vector<1x128xf32> to vector<8x128xf32>
    %277 = arith.addf %275, %276 : vector<8x128xf32>
    %278 = math.tanh %277 : vector<8x128xf32>
    %279 = vector.broadcast %10 : vector<1x128xf32> to vector<8x128xf32>
    %280 = arith.mulf %278, %279 : vector<8x128xf32>
    %281 = vector.broadcast %15 : vector<1x128xf32> to vector<8x128xf32>
    %282 = arith.addf %280, %281 : vector<8x128xf32>
    %283 = vector.extract_strided_slice %282 {offsets = [0, 0], sizes = [8, 32], strides = [1, 1]} : vector<8x128xf32> to vector<8x32xf32>
    %284 = vector.extract_strided_slice %282 {offsets = [0, 32], sizes = [8, 32], strides = [1, 1]} : vector<8x128xf32> to vector<8x32xf32>
    %285 = vector.extract_strided_slice %282 {offsets = [0, 64], sizes = [8, 32], strides = [1, 1]} : vector<8x128xf32> to vector<8x32xf32>
    %286 = vector.extract_strided_slice %282 {offsets = [0, 96], sizes = [8, 32], strides = [1, 1]} : vector<8x128xf32> to vector<8x32xf32>
    %287 = arith.mulf %284, %252 : vector<8x32xf32>
    %288 = arith.mulf %283, %286 : vector<8x32xf32>
    %289 = arith.addf %287, %288 : vector<8x32xf32>
    %290 = math.tanh %289 : vector<8x32xf32>
    %291 = arith.mulf %285, %290 : vector<8x32xf32>
    %292 = tpu.concatenate %274, %291 in 1 : vector<8x32xf32>, vector<8x32xf32> -> vector<8x64xf32>
    %cst_32 = arith.constant dense<0.000000e+00> : vector<8x256xf32>
    %293 = tpu.matmul %292, %0, %cst_32 {dimension_numbers = #tpu.dot_dimension_numbers<[1], [0], [0], [1], [0, 0, 1, 1], [], []>} : vector<8x64xf32>, vector<64x256xf32>, vector<8x256xf32> -> vector<8x256xf32>
    %294 = vector.extract_strided_slice %293 {offsets = [0, 128], sizes = [8, 128], strides = [1, 1]} : vector<8x256xf32> to vector<8x128xf32>
    %295 = vector.broadcast %3 : vector<1x128xf32> to vector<8x128xf32>
    %296 = arith.addf %294, %295 : vector<8x128xf32>
    %297 = math.tanh %296 : vector<8x128xf32>
    %298 = vector.broadcast %10 : vector<1x128xf32> to vector<8x128xf32>
    %299 = arith.mulf %297, %298 : vector<8x128xf32>
    %300 = vector.broadcast %15 : vector<1x128xf32> to vector<8x128xf32>
    %301 = arith.addf %299, %300 : vector<8x128xf32>
    %302 = vector.extract_strided_slice %301 {offsets = [0, 0], sizes = [8, 32], strides = [1, 1]} : vector<8x128xf32> to vector<8x32xf32>
    %303 = vector.extract_strided_slice %301 {offsets = [0, 32], sizes = [8, 32], strides = [1, 1]} : vector<8x128xf32> to vector<8x32xf32>
    %304 = vector.extract_strided_slice %301 {offsets = [0, 64], sizes = [8, 32], strides = [1, 1]} : vector<8x128xf32> to vector<8x32xf32>
    %305 = vector.extract_strided_slice %301 {offsets = [0, 96], sizes = [8, 32], strides = [1, 1]} : vector<8x128xf32> to vector<8x32xf32>
    %306 = arith.mulf %303, %289 : vector<8x32xf32>
    %307 = arith.mulf %302, %305 : vector<8x32xf32>
    %308 = arith.addf %306, %307 : vector<8x32xf32>
    %309 = math.tanh %308 : vector<8x32xf32>
    %310 = arith.mulf %304, %309 : vector<8x32xf32>
    %cst_33 = arith.constant dense<0.000000e+00> : vector<8x128xf32>
    %311 = tpu.matmul %310, %2, %cst_33 {dimension_numbers = #tpu.dot_dimension_numbers<[1], [0], [0], [1], [0, 0, 1, 1], [], []>} : vector<8x32xf32>, vector<32x128xf32>, vector<8x128xf32> -> vector<8x128xf32>
    %312 = vector.broadcast %4 : vector<1x128xf32> to vector<8x128xf32>
    %313 = arith.addf %311, %312 : vector<8x128xf32>
    %c0_34 = arith.constant 0 : index
    %c0_35 = arith.constant 0 : index
    %314 = vector.load %arg3[%c0_34, %c0_35] : memref<8x128xf32, #tpu.memory_space<vmem>>, vector<8x128xf32>
    tpu.vector_store %arg3[%c0_34, %c0_35], %313 {strides = array<i32>} : memref<8x128xf32, #tpu.memory_space<vmem>>, vector<8x128xf32>,
    %315 = tpu.concatenate %274, %272, %310, %308 in 1 : vector<8x32xf32>, vector<8x32xf32>, vector<8x32xf32>, vector<8x32xf32> -> vector<8x128xf32>
    %c0_36 = arith.constant 0 : index
    %c0_37 = arith.constant 0 : index
    %316 = vector.load %arg4[%c0_36, %c0_37] : memref<8x128xf32, #tpu.memory_space<vmem>>, vector<8x128xf32>
    tpu.vector_store %arg4[%c0_36, %c0_37], %315 {strides = array<i32>} : memref<8x128xf32, #tpu.memory_space<vmem>>, vector<8x128xf32>,
    return
  }
}

</mosaic_0001>

<bundles_post_ra>
// kernel: music_lstm_forward.1
= control target key start
LH: loop header
LB: loop body
LE: loop exit
PB: predicated region body
PF: predicated region fallthrough
CT: control target
= control target key end

     0   :  { %v37_v0 = vlaneseq  ;;  %v1391_v3 = vmov 0.5   ;;  %s1392_s17 = smov 32   ;;  %v1393_v39 = vmov 0.0   ;;  %vm67_vm1 = vcmask 261120   ;;  %s1395_s29 = smov 96   ;;  %s1749_s0 = inlined_call_operand.vmem [shape: f32[8,8,128], index: 0, kind: input, shape index: {}]   ;;  %s1750_s1 = inlined_call_operand.vmem [shape: f32[64,256], index: 1, kind: input, shape index: {}]   ;;  %s1751_s2 = inlined_call_operand.vmem [shape: f32[34,128], index: 2, kind: input, shape index: {}]   ;;  %s1752_s4 = inlined_call_operand.vmem [shape: f32[8,128], index: 4, kind: output, shape index: {1}]   ;;  %s1753_s3 = inlined_call_operand.vmem [shape: f32[8,128], index: 3, kind: output, shape index: {0}]  }
   0x1   :  { %v42_v1 = vld [vmem:[%s1749_s0] sm:$0xff]  ;;  %v17_v14 = vld [vmem:[%s1750_s1 + $0x8] sm:$0xff]  ;;  %v19_v15 = vld [vmem:[%s1750_s1 + $0x18] sm:$0xff]  ;;  %137 = vmatprep.mubr.f32.mxu0 %v1393_v39  ;;  %268 = vmatprep.mubr.f32.mxu1 %v1393_v39  ;;  %vm69_vm2 = vcmask 523264   ;;  %vm1397_vm3 = vmmov 0   ;;  %vm1143_vm4 = vcmask 785408  }
   0x2   :  { %1327 = vtanh.f32 %v42_v1  ;;  %v38_v2 = vand.u32 127, %v37_v0  ;;  %v16_v16 = vld [vmem:[%s1750_s1] sm:$0xff]  ;;  %v1447_v17 = vpack.c.bf16 %v19_v15, %v17_v14  ;;  %v18_v18 = vld [vmem:[%s1750_s1 + $0x10] sm:$0xff]  ;;  %v21_v19 = vld [vmem:[%s1750_s1 + $0x28] sm:$0xff]  ;;  %v1536_v44 = vshrl.u32 %v37_v0, 7 }
   0x3   :  { %v23_v20 = vld [vmem:[%s1750_s1 + $0x38] sm:$0xff]  ;;  %v1458_v21 = vpack.c.bf16 %v18_v18, %v16_v16  ;;  %v20_v23 = vld [vmem:[%s1750_s1 + $0x20] sm:$0xff]  ;;  %v22_v24 = vld [vmem:[%s1750_s1 + $0x30] sm:$0xff] }
   0x4   :  { %vm39_vm0 = vcmp.ge.s32.totalorder %v38_v2, 96  ;;  %v1460_v22 = vpack.c.bf16 %v23_v20, %v21_v19  ;;  %v25_v25 = vld [vmem:[%s1750_s1 + $0x48] sm:$0xff]  ;;  %1187 = vmatprep.subr.bf16.mxu0 %v1447_v17  ;;  %v27_v26 = vld [vmem:[%s1750_s1 + $0x58] sm:$0xff]  ;;  %1203 = vmatprep.subr.bf16.mxu1 %v1447_v17  ;;  %v1477_v27 = vpack.c.bf16 %v22_v24, %v20_v23  ;;  %v24_v29 = vld [vmem:[%s1750_s1 + $0x40] sm:$0xff]  ;;  %v169_v45 = vsub.s32 0, %v1536_v44 }
   0x5   :  { %v1427_v4 = vsel %vm39_vm0, 1.0, %v1391_v3  ;;  %v1429_v6 = vsel %vm39_vm0, 0.0, %v1391_v3  ;;  %1189 = vmatpush1.bf16.msra.mxu0 %v1458_v21  ;;  %1205 = vmatpush1.bf16.msra.mxu1 %v1458_v21  ;;  %v1481_v28 = vpack.c.bf16 %v27_v26, %v25_v25  ;;  %v26_v30 = vld [vmem:[%s1750_s1 + $0x50] sm:$0xff]  ;;  %v29_v31 = vld [vmem:[%s1750_s1 + $0x68] sm:$0xff]  ;;  %v31_v32 = vld [vmem:[%s1750_s1 + $0x78] sm:$0xff] }
   0x6   :  { %1191 = vmatprep.subr.bf16.mxu0 %v1460_v22  ;;  %1207 = vmatprep.subr.bf16.mxu1 %v1460_v22  ;;  %v1497_v33 = vpack.c.bf16 %v26_v30, %v24_v29  ;;  %v1501_v35 = vpack.c.bf16 %v31_v32, %v29_v31  ;;  %v28_v36 = vld [vmem:[%s1750_s1 + $0x60] sm:$0xff]  ;;  %v30_v37 = vld [vmem:[%s1750_s1 + $0x70] sm:$0xff]  ;;  %s1394_s1 = smov 64   ;;  %v1155_v47 = vld [vmem:[%s1749_s0 + $0x8] sm:$0xff] }
   0x7   :  { %v1512_v38 = vpack.c.bf16 %v30_v37, %v28_v36  ;;  %v1542_v46 = vld [vmem:[%s1751_s2 + $0x20] sm:$0x3]  ;;  %v1157_v16 = vld [vmem:[%s1749_s0 + $0x10] sm:$0xff] }
   0x8   :  { %v1548_v48 = vrot.slane %v1542_v46, %v169_v45 }
   0x9   :  { %1193 = vmatpush1.bf16.msra.mxu0 %v1477_v27  ;;  %1209 = vmatpush1.bf16.msra.mxu1 %v1477_v27 }
   0xa   :  { %1195 = vmatprep.subr.bf16.mxu0 %v1481_v28  ;;  %1211 = vmatprep.subr.bf16.mxu1 %v1481_v28 }
   0xc   :  { %v1328_v5 = vpop.eup %1327 }
   0xd   :  { %v44_v7 = vmul.f32 %v1328_v5, %v1427_v4  ;;  %1197 = vmatpush1.bf16.msra.mxu0 %v1497_v33  ;;  %1213 = vmatpush1.bf16.msra.mxu1 %v1497_v33 }
   0xe   :  { %1199 = vmatprep.subr.bf16.mxu0 %v1501_v35  ;;  %1215 = vmatprep.subr.bf16.mxu1 %v1501_v35 }
   0xf   :  { %v45_v8 = vadd.f32 %v44_v7, %v1429_v6 }
  0x11   :  { %48 = vrot.lane.b32.xlu0 %v45_v8, %s1392_s17  ;;  %v46_v11 = vmul.f32 0.0, %v45_v8  ;;  %1201 = vmatpush1.bf16.msra.mxu0 %v1512_v38 }
  0x12   :  { %1217 = vmatpush1.bf16.msra.mxu1 %v1512_v38  ;;  %1219 = vmatprep.subr.bf16.mxu0 %v1447_v17 }
  0x13   :  { %1235 = vmatprep.subr.bf16.mxu1 %v1447_v17 }
  0x83   :  { %v49_v9 = vpop.permute.xlu0 %48 }
  0x84   :  { %v51_v10 = vmul.f32 %v49_v9, %v45_v8 }
  0x86   :  { %53 = vrot.lane.b32.xlu0 %v51_v10, %s1392_s17 }
  0xf8   :  { %v54_v12 = vpop.permute.xlu0 %53 }
  0xf9   :  { %v1435_v13 = vadd.f32 %v54_v12, %v46_v11 }
  0xfb   :  { %1329 = vtanh.f32 %v1435_v13 }
 0x105   :  { %v1330_v34 = vpop.eup %1329 }
 0x106   :  { %59 = vrot.lane.b32.xlu1 %v1330_v34, %s1392_s17 }
 0x178   :  { %v60_v40 = vpop.permute.xlu1 %59 }
 0x179   :  { %v62_v41 = vmul.f32 %v60_v40, %v45_v8 }
 0x17b   :  { %64 = vrot.lane.b32.xlu1 %v62_v41, %s1394_s1 }
 0x1ed   :  { %v65_v42 = vpop.permute.xlu1 %64 }
 0x1ee   :  { %v68_v43 = vsel %vm67_vm1, %v65_v42, 0.0 }
 0x1ef   :  { %1154 = vmatmul.mubr.msk.f32.vlgmr.msra.gmra.mrb[0].mxu0 %vm69_vm2, %v68_v43 }
 0x1f0   :  { %1221 = vmatpush1.bf16.msra.mxu0 %v1458_v21  ;;  %395 = vmatprep.mubr.f32.mxu0 %v1393_v39 }
 0x1f1   :  { %1223 = vmatprep.subr.bf16.mxu0 %v1460_v22 }
 0x1f4   :  { %1225 = vmatpush1.bf16.msra.mxu0 %v1477_v27 }
 0x1f5   :  { %1227 = vmatprep.subr.bf16.mxu0 %v1481_v28 }
 0x1f8   :  { %1229 = vmatpush1.bf16.msra.mxu0 %v1497_v33 }
 0x1f9   :  { %1231 = vmatprep.subr.bf16.mxu0 %v1501_v35 }
 0x1fc   :  { %1233 = vmatpush1.bf16.msra.mxu0 %v1512_v38 }
 0x1fd   :  { %1251 = vmatprep.subr.bf16.mxu0 %v1447_v17 }
 0x2c2   :  { %v139_v49 = vpop.f32.mrb[0].mxu0 }
 0x2c3   :  { %v146_v50 = vadd.f32 %v1155_v47, %v139_v49  ;;  %v141_v51 = vpop.f32.mrb[1].mxu0 }
 0x2c4   :  { %v171_v52 = vadd.f32 %v1548_v48, %v141_v51 }
 0x2c5   :  { %1331 = vtanh.f32 %v146_v50 }
 0x2c6   :  { %1333 = vtanh.f32 %v171_v52 }
 0x2cf   :  { %v1332_v53 = vpop.eup %1331 }
 0x2d0   :  { %v1334_v54 = vpop.eup %1333  ;;  %v148_v55 = vmul.f32 %v1332_v53, %v1427_v4 }
 0x2d1   :  { %v173_v56 = vmul.f32 %v1334_v54, %v1427_v4 }
 0x2d2   :  { %v149_v57 = vadd.f32 %v148_v55, %v1429_v6 }
 0x2d3   :  { %v174_v58 = vadd.f32 %v173_v56, %v1429_v6 }
 0x2d4   :  { %152 = vrot.lane.b32.xlu0 %v149_v57, %s1392_s17  ;;  %v150_v63 = vmul.f32 %v149_v57, %v1435_v13 }
 0x2d5   :  { %177 = vrot.lane.b32.xlu1 %v174_v58, %s1392_s17  ;;  %v175_v1 = vmul.f32 0.0, %v174_v58 }
 0x346   :  { %v153_v59 = vpop.permute.xlu0 %152 }
 0x347   :  { %v155_v60 = vmul.f32 %v153_v59, %v149_v57  ;;  %v178_v61 = vpop.permute.xlu1 %177 }
 0x348   :  { %v180_v62 = vmul.f32 %v178_v61, %v174_v58 }
 0x349   :  { %157 = vrot.lane.b32.xlu0 %v155_v60, %s1392_s17 }
 0x34a   :  { %182 = vrot.lane.b32.xlu1 %v180_v62, %s1392_s17 }
 0x3bb   :  { %v158_v0 = vpop.permute.xlu0 %157 }
 0x3bc   :  { %v160_v2 = vadd.f32 %v158_v0, %v150_v63  ;;  %v183_v3 = vpop.permute.xlu1 %182 }
 0x3bd   :  { %v185_v5 = vadd.f32 %v183_v3, %v175_v1 }
 0x3be   :  { %1335 = vtanh.f32 %v160_v2 }
 0x3bf   :  { %1337 = vtanh.f32 %v185_v5 }
 0x3c8   :  { %v1336_v7 = vpop.eup %1335 }
 0x3c9   :  { %v1338_v8 = vpop.eup %1337  ;;  %163 = vrot.lane.b32.xlu0 %v1336_v7, %s1392_s17 }
 0x3ca   :  { %188 = vrot.lane.b32.xlu1 %v1338_v8, %s1392_s17 }
 0x43b   :  { %v164_v9 = vpop.permute.xlu0 %163 }
 0x43c   :  { %v166_v10 = vmul.f32 %v164_v9, %v149_v57  ;;  %v189_v11 = vpop.permute.xlu1 %188 }
 0x43d   :  { %v191_v12 = vmul.f32 %v189_v11, %v174_v58  ;;  %v1159_v58 = vld [vmem:[%s1749_s0 + $0x18] sm:$0xff] }
 0x43e   :  { %193 = vrot.lane.b32.xlu0 %v166_v10, %s1394_s1 }
 0x43f   :  { %197 = vrot.lane.b32.xlu1 %v191_v12, %s1395_s29 }
 0x4b0   :  { %v194_v13 = vpop.permute.xlu0 %193 }
 0x4b1   :  { %v198_v14 = vpop.permute.xlu1 %197 }
 0x4b2   :  { %v200_v15 = vsel %vm67_vm1, %v194_v13, %v198_v14 }
 0x4b3   :  { %1156 = vmatmul.mubr.msk.f32.vlgmr.msra.gmra.mrb[0].mxu1 %vm69_vm2, %v200_v15 }
 0x4b4   :  { %1237 = vmatpush1.bf16.msra.mxu1 %v1458_v21  ;;  %522 = vmatprep.mubr.f32.mxu1 %v1393_v39 }
 0x4b5   :  { %1239 = vmatprep.subr.bf16.mxu1 %v1460_v22 }
 0x4b8   :  { %1241 = vmatpush1.bf16.msra.mxu1 %v1477_v27 }
 0x4b9   :  { %1243 = vmatprep.subr.bf16.mxu1 %v1481_v28 }
 0x4bc   :  { %1245 = vmatpush1.bf16.msra.mxu1 %v1497_v33 }
 0x4bd   :  { %1247 = vmatprep.subr.bf16.mxu1 %v1501_v35 }
 0x4c0   :  { %1249 = vmatpush1.bf16.msra.mxu1 %v1512_v38 }
 0x4c1   :  { %1267 = vmatprep.subr.bf16.mxu1 %v1447_v17 }
 0x586   :  { %v270_v18 = vpop.f32.mrb[0].mxu1 }
 0x587   :  { %v277_v19 = vadd.f32 %v1157_v16, %v270_v18  ;;  %v272_v20 = vpop.f32.mrb[1].mxu1 }
 0x588   :  { %v298_v23 = vadd.f32 %v272_v20, %v1548_v48 }
 0x589   :  { %1339 = vtanh.f32 %v277_v19 }
 0x58a   :  { %1341 = vtanh.f32 %v298_v23 }
 0x593   :  { %v1340_v24 = vpop.eup %1339 }
 0x594   :  { %v1342_v25 = vpop.eup %1341  ;;  %v279_v26 = vmul.f32 %v1340_v24, %v1427_v4 }
 0x595   :  { %v300_v29 = vmul.f32 %v1342_v25, %v1427_v4 }
 0x596   :  { %v280_v30 = vadd.f32 %v279_v26, %v1429_v6 }
 0x597   :  { %v301_v31 = vadd.f32 %v300_v29, %v1429_v6 }
 0x598   :  { %283 = vrot.lane.b32.xlu0 %v280_v30, %s1392_s17  ;;  %v281_v40 = vmul.f32 %v280_v30, %v160_v2 }
 0x599   :  { %304 = vrot.lane.b32.xlu1 %v301_v31, %s1392_s17  ;;  %v302_v42 = vmul.f32 %v301_v31, %v185_v5 }
 0x60a   :  { %v284_v32 = vpop.permute.xlu0 %283 }
 0x60b   :  { %v286_v34 = vmul.f32 %v284_v32, %v280_v30  ;;  %v305_v36 = vpop.permute.xlu1 %304 }
 0x60c   :  { %v307_v37 = vmul.f32 %v305_v36, %v301_v31 }
 0x60d   :  { %288 = vrot.lane.b32.xlu0 %v286_v34, %s1392_s17 }
 0x60e   :  { %309 = vrot.lane.b32.xlu1 %v307_v37, %s1392_s17 }
 0x67f   :  { %v289_v41 = vpop.permute.xlu0 %288 }
 0x680   :  { %v291_v43 = vadd.f32 %v289_v41, %v281_v40  ;;  %v310_v45 = vpop.permute.xlu1 %309 }
 0x681   :  { %v312_v47 = vadd.f32 %v310_v45, %v302_v42 }
 0x682   :  { %1343 = vtanh.f32 %v291_v43 }
 0x683   :  { %1345 = vtanh.f32 %v312_v47 }
 0x68c   :  { %v1344_v49 = vpop.eup %1343 }
 0x68d   :  { %v1346_v50 = vpop.eup %1345  ;;  %294 = vrot.lane.b32.xlu0 %v1344_v49, %s1392_s17 }
 0x68e   :  { %315 = vrot.lane.b32.xlu1 %v1346_v50, %s1392_s17 }
 0x6ff   :  { %v295_v51 = vpop.permute.xlu0 %294 }
 0x700   :  { %v297_v52 = vmul.f32 %v295_v51, %v280_v30  ;;  %v316_v53 = vpop.permute.xlu1 %315 }
 0x701   :  { %v318_v54 = vmul.f32 %v316_v53, %v301_v31  ;;  %v1161_v31 = vld [vmem:[%s1749_s0 + $0x20] sm:$0xff] }
 0x702   :  { %320 = vrot.lane.b32.xlu0 %v297_v52, %s1394_s1 }
 0x703   :  { %324 = vrot.lane.b32.xlu1 %v318_v54, %s1395_s29 }
 0x774   :  { %v321_v55 = vpop.permute.xlu0 %320 }
 0x775   :  { %v325_v56 = vpop.permute.xlu1 %324 }
 0x776   :  { %v327_v57 = vsel %vm67_vm1, %v321_v55, %v325_v56 }
 0x777   :  { %1158 = vmatmul.mubr.msk.f32.vlgmr.msra.gmra.mrb[2].mxu0 %vm69_vm2, %v327_v57 }
 0x778   :  { %1253 = vmatpush1.bf16.msra.mxu0 %v1458_v21  ;;  %649 = vmatprep.mubr.f32.mxu0 %v1393_v39 }
 0x779   :  { %1255 = vmatprep.subr.bf16.mxu0 %v1460_v22 }
 0x77c   :  { %1257 = vmatpush1.bf16.msra.mxu0 %v1477_v27 }
 0x77d   :  { %1259 = vmatprep.subr.bf16.mxu0 %v1481_v28 }
 0x780   :  { %1261 = vmatpush1.bf16.msra.mxu0 %v1497_v33 }
 0x781   :  { %1263 = vmatprep.subr.bf16.mxu0 %v1501_v35 }
 0x784   :  { %1265 = vmatpush1.bf16.msra.mxu0 %v1512_v38 }
 0x785   :  { %1283 = vmatprep.subr.bf16.mxu0 %v1447_v17 }
 0x84a   :  { %v397_v59 = vpop.f32.mrb[2].mxu0 }
 0x84b   :  { %v404_v60 = vadd.f32 %v1159_v58, %v397_v59  ;;  %v399_v61 = vpop.f32.mrb[3].mxu0 }
 0x84c   :  { %v425_v62 = vadd.f32 %v399_v61, %v1548_v48 }
 0x84d   :  { %1347 = vtanh.f32 %v404_v60 }
 0x84e   :  { %1349 = vtanh.f32 %v425_v62 }
 0x857   :  { %v1348_v63 = vpop.eup %1347 }
 0x858   :  { %v1350_v0 = vpop.eup %1349  ;;  %v406_v1 = vmul.f32 %v1348_v63, %v1427_v4 }
 0x859   :  { %v427_v2 = vmul.f32 %v1350_v0, %v1427_v4 }
 0x85a   :  { %v407_v3 = vadd.f32 %v406_v1, %v1429_v6 }
 0x85b   :  { %v428_v5 = vadd.f32 %v427_v2, %v1429_v6 }
 0x85c   :  { %410 = vrot.lane.b32.xlu0 %v407_v3, %s1392_s17  ;;  %v408_v11 = vmul.f32 %v407_v3, %v291_v43 }
 0x85d   :  { %431 = vrot.lane.b32.xlu1 %v428_v5, %s1392_s17  ;;  %v429_v13 = vmul.f32 %v428_v5, %v312_v47 }
 0x8ce   :  { %v411_v7 = vpop.permute.xlu0 %410 }
 0x8cf   :  { %v413_v8 = vmul.f32 %v411_v7, %v407_v3  ;;  %v432_v9 = vpop.permute.xlu1 %431 }
 0x8d0   :  { %v434_v10 = vmul.f32 %v432_v9, %v428_v5 }
 0x8d1   :  { %415 = vrot.lane.b32.xlu0 %v413_v8, %s1392_s17 }
 0x8d2   :  { %436 = vrot.lane.b32.xlu1 %v434_v10, %s1392_s17 }
 0x943   :  { %v416_v12 = vpop.permute.xlu0 %415 }
 0x944   :  { %v418_v14 = vadd.f32 %v416_v12, %v408_v11  ;;  %v437_v15 = vpop.permute.xlu1 %436 }
 0x945   :  { %v439_v16 = vadd.f32 %v437_v15, %v429_v13 }
 0x946   :  { %1351 = vtanh.f32 %v418_v14 }
 0x947   :  { %1353 = vtanh.f32 %v439_v16 }
 0x950   :  { %v1352_v18 = vpop.eup %1351 }
 0x951   :  { %v1354_v19 = vpop.eup %1353  ;;  %421 = vrot.lane.b32.xlu0 %v1352_v18, %s1392_s17 }
 0x952   :  { %442 = vrot.lane.b32.xlu1 %v1354_v19, %s1392_s17 }
 0x9c3   :  { %v422_v20 = vpop.permute.xlu0 %421 }
 0x9c4   :  { %v424_v23 = vmul.f32 %v422_v20, %v407_v3  ;;  %v443_v24 = vpop.permute.xlu1 %442  ;;  %v1163_v3 = vld [vmem:[%s1749_s0 + $0x28] sm:$0xff] }
 0x9c5   :  { %v445_v25 = vmul.f32 %v443_v24, %v428_v5 }
 0x9c6   :  { %447 = vrot.lane.b32.xlu0 %v424_v23, %s1394_s1 }
 0x9c7   :  { %451 = vrot.lane.b32.xlu1 %v445_v25, %s1395_s29 }
 0xa38   :  { %v448_v26 = vpop.permute.xlu0 %447 }
 0xa39   :  { %v452_v29 = vpop.permute.xlu1 %451 }
 0xa3a   :  { %v454_v30 = vsel %vm67_vm1, %v448_v26, %v452_v29 }
 0xa3b   :  { %1160 = vmatmul.mubr.msk.f32.vlgmr.msra.gmra.mrb[2].mxu1 %vm69_vm2, %v454_v30 }
 0xa3c   :  { %1269 = vmatpush1.bf16.msra.mxu1 %v1458_v21  ;;  %776 = vmatprep.mubr.f32.mxu1 %v1393_v39 }
 0xa3d   :  { %1271 = vmatprep.subr.bf16.mxu1 %v1460_v22 }
 0xa40   :  { %1273 = vmatpush1.bf16.msra.mxu1 %v1477_v27 }
 0xa41   :  { %1275 = vmatprep.subr.bf16.mxu1 %v1481_v28 }
 0xa44   :  { %1277 = vmatpush1.bf16.msra.mxu1 %v1497_v33 }
 0xa45   :  { %1279 = vmatprep.subr.bf16.mxu1 %v1501_v35 }
 0xa48   :  { %1281 = vmatpush1.bf16.msra.mxu1 %v1512_v38 }
 0xa49   :  { %1299 = vmatprep.subr.bf16.mxu1 %v1447_v17 }
 0xb0e   :  { %v524_v32 = vpop.f32.mrb[2].mxu1 }
 0xb0f   :  { %v531_v34 = vadd.f32 %v1161_v31, %v524_v32  ;;  %v526_v36 = vpop.f32.mrb[3].mxu1 }
 0xb10   :  { %v552_v37 = vadd.f32 %v526_v36, %v1548_v48 }
 0xb11   :  { %1355 = vtanh.f32 %v531_v34 }
 0xb12   :  { %1357 = vtanh.f32 %v552_v37 }
 0xb1b   :  { %v1356_v40 = vpop.eup %1355 }
 0xb1c   :  { %v1358_v41 = vpop.eup %1357  ;;  %v533_v42 = vmul.f32 %v1356_v40, %v1427_v4 }
 0xb1d   :  { %v554_v43 = vmul.f32 %v1358_v41, %v1427_v4 }
 0xb1e   :  { %v534_v45 = vadd.f32 %v533_v42, %v1429_v6 }
 0xb1f   :  { %v555_v17 = vadd.f32 %v554_v43, %v1429_v6 }
 0xb20   :  { %537 = vrot.lane.b32.xlu0 %v534_v45, %s1392_s17  ;;  %v535_v52 = vmul.f32 %v534_v45, %v418_v14 }
 0xb21   :  { %558 = vrot.lane.b32.xlu1 %v555_v17, %s1392_s17  ;;  %v556_v54 = vmul.f32 %v555_v17, %v439_v16 }
 0xb92   :  { %v538_v47 = vpop.permute.xlu0 %537 }
 0xb93   :  { %v540_v49 = vmul.f32 %v538_v47, %v534_v45  ;;  %v559_v50 = vpop.permute.xlu1 %558 }
 0xb94   :  { %v561_v51 = vmul.f32 %v559_v50, %v555_v17 }
 0xb95   :  { %542 = vrot.lane.b32.xlu0 %v540_v49, %s1392_s17 }
 0xb96   :  { %563 = vrot.lane.b32.xlu1 %v561_v51, %s1392_s17 }
 0xc07   :  { %v543_v53 = vpop.permute.xlu0 %542 }
 0xc08   :  { %v545_v55 = vadd.f32 %v543_v53, %v535_v52  ;;  %v564_v56 = vpop.permute.xlu1 %563 }
 0xc09   :  { %v566_v57 = vadd.f32 %v564_v56, %v556_v54 }
 0xc0a   :  { %1359 = vtanh.f32 %v545_v55 }
 0xc0b   :  { %1361 = vtanh.f32 %v566_v57 }
 0xc14   :  { %v1360_v58 = vpop.eup %1359 }
 0xc15   :  { %v1362_v59 = vpop.eup %1361  ;;  %548 = vrot.lane.b32.xlu0 %v1360_v58, %s1392_s17 }
 0xc16   :  { %569 = vrot.lane.b32.xlu1 %v1362_v59, %s1392_s17 }
 0xc87   :  { %v549_v60 = vpop.permute.xlu0 %548 }
 0xc88   :  { %v551_v61 = vmul.f32 %v549_v60, %v534_v45  ;;  %v570_v62 = vpop.permute.xlu1 %569  ;;  %v1165_v45 = vld [vmem:[%s1749_s0 + $0x30] sm:$0xff] }
 0xc89   :  { %v572_v63 = vmul.f32 %v570_v62, %v555_v17 }
 0xc8a   :  { %574 = vrot.lane.b32.xlu0 %v551_v61, %s1394_s1 }
 0xc8b   :  { %578 = vrot.lane.b32.xlu1 %v572_v63, %s1395_s29 }
 0xcfc   :  { %v575_v0 = vpop.permute.xlu0 %574 }
 0xcfd   :  { %v579_v1 = vpop.permute.xlu1 %578 }
 0xcfe   :  { %v581_v2 = vsel %vm67_vm1, %v575_v0, %v579_v1 }
 0xcff   :  { %1162 = vmatmul.mubr.msk.f32.vlgmr.msra.gmra.mrb[4].mxu0 %vm69_vm2, %v581_v2 }
 0xd00   :  { %1285 = vmatpush1.bf16.msra.mxu0 %v1458_v21  ;;  %903 = vmatprep.mubr.f32.mxu0 %v1393_v39 }
 0xd01   :  { %1287 = vmatprep.subr.bf16.mxu0 %v1460_v22 }
 0xd04   :  { %1289 = vmatpush1.bf16.msra.mxu0 %v1477_v27 }
 0xd05   :  { %1291 = vmatprep.subr.bf16.mxu0 %v1481_v28 }
 0xd08   :  { %1293 = vmatpush1.bf16.msra.mxu0 %v1497_v33 }
 0xd09   :  { %1295 = vmatprep.subr.bf16.mxu0 %v1501_v35 }
 0xd0c   :  { %1297 = vmatpush1.bf16.msra.mxu0 %v1512_v38 }
 0xdd2   :  { %v651_v5 = vpop.f32.mrb[4].mxu0 }
 0xdd3   :  { %v658_v7 = vadd.f32 %v1163_v3, %v651_v5  ;;  %v653_v8 = vpop.f32.mrb[5].mxu0 }
 0xdd4   :  { %v679_v9 = vadd.f32 %v653_v8, %v1548_v48 }
 0xdd5   :  { %1363 = vtanh.f32 %v658_v7  ;;  %v1167_v7 = vld [vmem:[%s1749_s0 + $0x38] sm:$0xff] }
 0xdd6   :  { %1365 = vtanh.f32 %v679_v9 }
 0xddf   :  { %v1364_v10 = vpop.eup %1363 }
 0xde0   :  { %v1366_v11 = vpop.eup %1365  ;;  %v660_v12 = vmul.f32 %v1364_v10, %v1427_v4 }
 0xde1   :  { %v681_v13 = vmul.f32 %v1366_v11, %v1427_v4 }
 0xde2   :  { %v661_v14 = vadd.f32 %v660_v12, %v1429_v6 }
 0xde3   :  { %v682_v15 = vadd.f32 %v681_v13, %v1429_v6 }
 0xde4   :  { %664 = vrot.lane.b32.xlu0 %v661_v14, %s1392_s17  ;;  %v662_v23 = vmul.f32 %v661_v14, %v545_v55 }
 0xde5   :  { %685 = vrot.lane.b32.xlu1 %v682_v15, %s1392_s17  ;;  %v683_v25 = vmul.f32 %v682_v15, %v566_v57 }
 0xe56   :  { %v665_v16 = vpop.permute.xlu0 %664 }
 0xe57   :  { %v667_v18 = vmul.f32 %v665_v16, %v661_v14  ;;  %v686_v19 = vpop.permute.xlu1 %685 }
 0xe58   :  { %v688_v20 = vmul.f32 %v686_v19, %v682_v15 }
 0xe59   :  { %669 = vrot.lane.b32.xlu0 %v667_v18, %s1392_s17 }
 0xe5a   :  { %690 = vrot.lane.b32.xlu1 %v688_v20, %s1392_s17 }
 0xecb   :  { %v670_v24 = vpop.permute.xlu0 %669 }
 0xecc   :  { %v672_v26 = vadd.f32 %v670_v24, %v662_v23  ;;  %v691_v29 = vpop.permute.xlu1 %690 }
 0xecd   :  { %v693_v30 = vadd.f32 %v691_v29, %v683_v25 }
 0xece   :  { %1367 = vtanh.f32 %v672_v26 }
 0xecf   :  { %1369 = vtanh.f32 %v693_v30 }
 0xed8   :  { %v1368_v31 = vpop.eup %1367 }
 0xed9   :  { %v1370_v32 = vpop.eup %1369  ;;  %675 = vrot.lane.b32.xlu0 %v1368_v31, %s1392_s17 }
 0xeda   :  { %696 = vrot.lane.b32.xlu1 %v1370_v32, %s1392_s17 }
 0xf4b   :  { %v676_v34 = vpop.permute.xlu0 %675 }
 0xf4c   :  { %v678_v36 = vmul.f32 %v676_v34, %v661_v14  ;;  %v697_v37 = vpop.permute.xlu1 %696 }
 0xf4d   :  { %v699_v40 = vmul.f32 %v697_v37, %v682_v15 }
 0xf4e   :  { %701 = vrot.lane.b32.xlu0 %v678_v36, %s1394_s1 }
 0xf4f   :  { %705 = vrot.lane.b32.xlu1 %v699_v40, %s1395_s29 }
 0xfc0   :  { %v702_v41 = vpop.permute.xlu0 %701 }
 0xfc1   :  { %v706_v42 = vpop.permute.xlu1 %705 }
 0xfc2   :  { %v708_v43 = vsel %vm67_vm1, %v702_v41, %v706_v42 }
 0xfc3   :  { %1164 = vmatmul.mubr.msk.f32.vlgmr.msra.gmra.mrb[4].mxu1 %vm69_vm2, %v708_v43 }
 0xfc4   :  { %1301 = vmatpush1.bf16.msra.mxu1 %v1458_v21  ;;  %1030 = vmatprep.mubr.f32.mxu1 %v1393_v39 }
 0xfc5   :  { %1303 = vmatprep.subr.bf16.mxu1 %v1460_v22 }
 0xfc8   :  { %1305 = vmatpush1.bf16.msra.mxu1 %v1477_v27 }
 0xfc9   :  { %1307 = vmatprep.subr.bf16.mxu1 %v1481_v28 }
 0xfcc   :  { %1309 = vmatpush1.bf16.msra.mxu1 %v1497_v33 }
 0xfcd   :  { %1311 = vmatprep.subr.bf16.mxu1 %v1501_v35 }
 0xfd0   :  { %1313 = vmatpush1.bf16.msra.mxu1 %v1512_v38 }
0x1096   :  { %v778_v17 = vpop.f32.mrb[4].mxu1 }
0x1097   :  { %v785_v21 = vadd.f32 %v1165_v45, %v778_v17  ;;  %v780_v47 = vpop.f32.mrb[5].mxu1 }
0x1098   :  { %v806_v49 = vadd.f32 %v780_v47, %v1548_v48 }
0x1099   :  { %1371 = vtanh.f32 %v785_v21 }
0x109a   :  { %1373 = vtanh.f32 %v806_v49 }
0x10a3   :  { %v1372_v22 = vpop.eup %1371 }
0x10a4   :  { %v1374_v27 = vpop.eup %1373  ;;  %v787_v28 = vmul.f32 %v1372_v22, %v1427_v4 }
0x10a5   :  { %v808_v33 = vmul.f32 %v1374_v27, %v1427_v4 }
0x10a6   :  { %v788_v35 = vadd.f32 %v787_v28, %v1429_v6 }
0x10a7   :  { %v809_v38 = vadd.f32 %v808_v33, %v1429_v6 }
0x10a8   :  { %791 = vrot.lane.b32.xlu0 %v788_v35, %s1392_s17  ;;  %v789_v54 = vmul.f32 %v788_v35, %v672_v26 }
0x10a9   :  { %812 = vrot.lane.b32.xlu1 %v809_v38, %s1392_s17  ;;  %v810_v56 = vmul.f32 %v809_v38, %v693_v30 }
0x111a   :  { %v792_v50 = vpop.permute.xlu0 %791 }
0x111b   :  { %v794_v51 = vmul.f32 %v792_v50, %v788_v35  ;;  %v813_v52 = vpop.permute.xlu1 %812 }
0x111c   :  { %v815_v53 = vmul.f32 %v813_v52, %v809_v38  ;;  %v1396_v52 = vmov 0.0|0.0  }
0x111d   :  { %796 = vrot.lane.b32.xlu0 %v794_v51, %s1392_s17  ;;  %1314 = vmatprep.subr.bf16.mxu0 %v1396_v52 }
0x111e   :  { %817 = vrot.lane.b32.xlu1 %v815_v53, %s1392_s17 }
0x118f   :  { %v797_v55 = vpop.permute.xlu0 %796 }
0x1190   :  { %v799_v57 = vadd.f32 %v797_v55, %v789_v54  ;;  %v818_v58 = vpop.permute.xlu1 %817  ;;  %v35_v54 = vld [vmem:[%s1751_s2 + $0x18] sm:$0xff] }
0x1191   :  { %v820_v59 = vadd.f32 %v818_v58, %v810_v56 }
0x1192   :  { %1375 = vtanh.f32 %v799_v57 }
0x1193   :  { %1377 = vtanh.f32 %v820_v59 }
0x119c   :  { %v1376_v60 = vpop.eup %1375 }
0x119d   :  { %v1378_v61 = vpop.eup %1377  ;;  %802 = vrot.lane.b32.xlu0 %v1376_v60, %s1392_s17 }
0x119e   :  { %823 = vrot.lane.b32.xlu1 %v1378_v61, %s1392_s17 }
0x120f   :  { %v803_v62 = vpop.permute.xlu0 %802 }
0x1210   :  { %v805_v63 = vmul.f32 %v803_v62, %v788_v35  ;;  %v824_v0 = vpop.permute.xlu1 %823 }
0x1211   :  { %v826_v1 = vmul.f32 %v824_v0, %v809_v38 }
0x1212   :  { %828 = vrot.lane.b32.xlu0 %v805_v63, %s1394_s1  ;;  %v1059_v63 = vsub.s32 1, %v1536_v44 }
0x1213   :  { %832 = vrot.lane.b32.xlu1 %v826_v1, %s1395_s29 }
0x1214   :  { %v1060_v0 = vrot.slane %v1542_v46, %v1059_v63 }
0x1284   :  { %v829_v2 = vpop.permute.xlu0 %828 }
0x1285   :  { %v833_v3 = vpop.permute.xlu1 %832 }
0x1286   :  { %v835_v5 = vsel %vm67_vm1, %v829_v2, %v833_v3 }
0x1287   :  { %1166 = vmatmul.mubr.msk.f32.vlgmr.msra.gmra.mrb[6].mxu0 %vm69_vm2, %v835_v5 }
0x1288   :  { %1183 = vmatprep.mubr.msk.f32.mxu0 %vm1397_vm3, %v1393_v39 }
0x135a   :  { %v905_v8 = vpop.f32.mrb[6].mxu0 }
0x135b   :  { %v912_v9 = vadd.f32 %v1167_v7, %v905_v8  ;;  %v907_v10 = vpop.f32.mrb[7].mxu0 }
0x135c   :  { %v933_v11 = vadd.f32 %v907_v10, %v1548_v48 }
0x135d   :  { %1379 = vtanh.f32 %v912_v9 }
0x135e   :  { %1381 = vtanh.f32 %v933_v11 }
0x1367   :  { %v1380_v12 = vpop.eup %1379 }
0x1368   :  { %v1382_v13 = vpop.eup %1381  ;;  %v914_v14 = vmul.f32 %v1380_v12, %v1427_v4 }
0x1369   :  { %v935_v15 = vmul.f32 %v1382_v13, %v1427_v4 }
0x136a   :  { %v915_v16 = vadd.f32 %v914_v14, %v1429_v6 }
0x136b   :  { %v936_v18 = vadd.f32 %v935_v15, %v1429_v6 }
0x136c   :  { %918 = vrot.lane.b32.xlu0 %v915_v16, %s1392_s17  ;;  %v916_v25 = vmul.f32 %v915_v16, %v799_v57 }
0x136d   :  { %939 = vrot.lane.b32.xlu1 %v936_v18, %s1392_s17  ;;  %v937_v29 = vmul.f32 %v936_v18, %v820_v59 }
0x13de   :  { %v919_v19 = vpop.permute.xlu0 %918 }
0x13df   :  { %v921_v20 = vmul.f32 %v919_v19, %v915_v16  ;;  %v940_v23 = vpop.permute.xlu1 %939 }
0x13e0   :  { %v942_v24 = vmul.f32 %v940_v23, %v936_v18 }
0x13e1   :  { %923 = vrot.lane.b32.xlu0 %v921_v20, %s1392_s17 }
0x13e2   :  { %944 = vrot.lane.b32.xlu1 %v942_v24, %s1392_s17 }
0x1453   :  { %v924_v26 = vpop.permute.xlu0 %923 }
0x1454   :  { %v926_v30 = vadd.f32 %v924_v26, %v916_v25  ;;  %v945_v31 = vpop.permute.xlu1 %944 }
0x1455   :  { %v947_v32 = vadd.f32 %v945_v31, %v937_v29 }
0x1456   :  { %1383 = vtanh.f32 %v926_v30 }
0x1457   :  { %1385 = vtanh.f32 %v947_v32 }
0x1460   :  { %v1384_v34 = vpop.eup %1383 }
0x1461   :  { %v1386_v36 = vpop.eup %1385  ;;  %929 = vrot.lane.b32.xlu0 %v1384_v34, %s1392_s17 }
0x1462   :  { %950 = vrot.lane.b32.xlu1 %v1386_v36, %s1392_s17 }
0x14d3   :  { %v930_v37 = vpop.permute.xlu0 %929 }
0x14d4   :  { %v932_v40 = vmul.f32 %v930_v37, %v915_v16  ;;  %v951_v41 = vpop.permute.xlu1 %950 }
0x14d5   :  { %v953_v42 = vmul.f32 %v951_v41, %v936_v18 }
0x14d6   :  { %955 = vrot.lane.b32.xlu0 %v932_v40, %s1394_s1 }
0x14d7   :  { %959 = vrot.lane.b32.xlu1 %v953_v42, %s1395_s29 }
0x1548   :  { %v956_v43 = vpop.permute.xlu0 %955 }
0x1549   :  { %v960_v45 = vpop.permute.xlu1 %959  ;;  %v1141_v59 = vsel %vm67_vm1, %v956_v43, %v926_v30 }
0x154a   :  { %v962_v17 = vsel %vm67_vm1, %v956_v43, %v960_v45 }
0x154b   :  { %1168 = vmatmul.mubr.msk.f32.vlgmr.msra.gmra.mrb[6].mxu1 %vm69_vm2, %v962_v17 }
0x161e   :  { %v1032_v21 = vpop.f32.mrb[6].mxu1 }
0x161f   :  { %v1033_v47 = vpop.f32.mrb[7].mxu1 }
0x1620   :  { %v1036_v49 = vadd.f32 %v1033_v47, %v1548_v48  ;;  %v32_v48 = vld [vmem:[%s1751_s2] sm:$0xff] }
0x1622   :  { %1387 = vtanh.f32 %v1036_v49 }
0x162c   :  { %v1388_v22 = vpop.eup %1387 }
0x162d   :  { %v1038_v27 = vmul.f32 %v1388_v22, %v1427_v4  ;;  %v33_v4 = vld [vmem:[%s1751_s2 + $0x8] sm:$0xff] }
0x162e   :  { %v1315_v53 = vpack.c.bf16 %v33_v4, %v32_v48 }
0x162f   :  { %v1039_v28 = vadd.f32 %v1038_v27, %v1429_v6  ;;  %v34_v6 = vld [vmem:[%s1751_s2 + $0x10] sm:$0xff] }
0x1630   :  { %1316 = vmatpush3.bf16.msra.mxu0 %v1315_v53  ;;  %v1318_v55 = vpack.c.bf16 %v35_v54, %v34_v6 }
0x1631   :  { %1042 = vrot.lane.b32.xlu0 %v1039_v28, %s1392_s17  ;;  %v1040_v38 = vmul.f32 %v1039_v28, %v947_v32  ;;  %1317 = vmatprep.subr.bf16.mxu0 %v1396_v52 }
0x1634   :  { %1319 = vmatpush3.bf16.msra.mxu0 %v1318_v55 }
0x16a3   :  { %v1043_v33 = vpop.permute.xlu0 %1042 }
0x16a4   :  { %v1045_v35 = vmul.f32 %v1043_v33, %v1039_v28 }
0x16a6   :  { %1047 = vrot.lane.b32.xlu1 %v1045_v35, %s1392_s17 }
0x1718   :  { %v1048_v50 = vpop.permute.xlu1 %1047 }
0x1719   :  { %v1050_v51 = vadd.f32 %v1048_v50, %v1040_v38 }
0x171b   :  { %1389 = vtanh.f32 %v1050_v51 }
0x1725   :  { %v1390_v56 = vpop.eup %1389 }
0x1726   :  { %1053 = vrot.lane.b32.xlu0 %v1390_v56, %s1392_s17 }
0x172a   :  { %1138 = vrot.lane.b32.xlu0 %v1050_v51, %s1394_s1 }
0x1798   :  { %v1054_v57 = vpop.permute.xlu0 %1053 }
0x1799   :  { %v1056_v58 = vmul.f32 %v1054_v57, %v1039_v28 }
0x179b   :  { %1062 = vrot.lane.b32.xlu1 %v1056_v58, %s1394_s1  ;;  %v1142_v60 = vsel %vm69_vm2, %v1141_v59, %v1056_v58 }
0x179c   :  { %v1139_v61 = vpop.permute.xlu0 %1138 }
0x179d   :  { %v1144_v39 = vsel %vm1143_vm4, %v1142_v60, %v1139_v61 }
0x179e   :  { %1145 = vst [vmem:[%s1752_s4] sm:$0xff] %v1144_v39 }
0x180d   :  { %v1063_v62 = vpop.permute.xlu1 %1062 }
0x180e   :  { %1184 = vmatmul.mubr.msk.f32.vlgmr.msra.gmra.mrb[8].mxu0 %vm67_vm1, %v1063_v62 }
0x18e1   :  { %v1132_v1 = vpop.f32.mrb[8].mxu0 }
0x18e2   :  { %v1133_v2 = vadd.f32 %v1132_v1, %v1060_v0  ;;  %v1185_v3 = vpop.f32.mrb[9].mxu0 }
0x18e4   :  { %1136 = vst [vmem:[%s1753_s3] sm:$0xff] %v1133_v2 }

</bundles_post_ra>
